<compile_context>
chip_gen: v7x
topology: tpu7x:2x2x1
jax: 0.10.0
libtpu: 0.0.40
codegen_flags: <defaults>
</compile_context>

<pallas_src>
import random
from functools import partial

import numpy as np
import jax
import jax.numpy as jnp
from jax.experimental import pallas as pl
from jax.experimental.pallas import tpu as pltpu


# --------------------------- in-kernel color math ---------------------------

def _rgb_to_gray(r, g, b):
    # torchvision F.rgb_to_grayscale coefficients
    return 0.2989 * r + 0.587 * g + 0.114 * b


def _blend(img1, img2, ratio):
    # torchvision _blend for float images (bound = 1.0)
    return jnp.clip(ratio * img1 + (1.0 - ratio) * img2, 0.0, 1.0)


def _floor_mod1(x):
    # x % 1.0 with floor semantics
    return x - jnp.floor(x)


def _adjust_hue(r, g, b, hue_factor):
    """torchvision F.adjust_hue (RGB -> HSV, shift hue, HSV -> RGB).

    VALU-trimmed: one shared reciprocal for the chroma divides, hoisted
    sextant masks reused for all three channels, no redundant clamps.
    """
    maxc = jnp.maximum(jnp.maximum(r, g), b)
    minc = jnp.minimum(jnp.minimum(r, g), b)
    v = maxc
    cr = maxc - minc
    eqc = maxc == minc
    ones = jnp.ones_like(maxc)
    maxc_safe = jnp.where(eqc, ones, maxc)
    cr_safe = jnp.where(eqc, ones, cr)
    s = cr / maxc_safe
    inv_cr = 1.0 / cr_safe                       # shared across rc/gc/bc
    rc = (maxc - r) * inv_cr
    gc = (maxc - g) * inv_cr
    bc = (maxc - b) * inv_cr
    hr = jnp.where(maxc == r, bc - gc, 0.0)
    hg = jnp.where((maxc == g) & (maxc != r), 2.0 + rc - bc, 0.0)
    hb = jnp.where((maxc != g) & (maxc != r), 4.0 + gc - rc, 0.0)
    h = _floor_mod1((hr + hg + hb) * (1.0 / 6.0) + 1.0)

    # hue shift
    h = _floor_mod1(h + hue_factor)

    # _hsv2rgb
    h6 = h * 6.0
    i_f = jnp.floor(h6)
    f = h6 - i_f
    i_f = jnp.where(i_f >= 6.0, i_f - 6.0, i_f)   # == i % 6 for h in [0, 1)
    p = v * (1.0 - s)
    q = v * (1.0 - s * f)
    t = v * (1.0 - s * (1.0 - f))

    masks = tuple(i_f == float(k) for k in range(5))   # hoisted, shared by R/G/B

    def pick(vals):
        out = vals[5]
        for k in range(4, -1, -1):
            out = jnp.where(masks[k], vals[k], out)
        return out

    return (pick((v, q, p, p, t, v)),
            pick((t, v, v, q, p, p)),
            pick((p, p, t, v, v, q)))


def _jitter_ops(r, g, b, params_ref, order, apply_jitter):
    """ColorJitter ops in the (static) sampled order.  Rank-agnostic: the
    channel arrays only carry the frame dim + pixel dims, so a mean over the
    last axis is exactly torchvision's per-frame adjust_contrast mean."""
    if not apply_jitter:                # static: RandomApply decided on the host
        return r, g, b
    for op in order:                    # static permutation -> straight-line code
        if op == 0:                     # brightness: blend(img, 0, f)
            f = params_ref[0]
            r = jnp.clip(f * r, 0.0, 1.0)
            g = jnp.clip(f * g, 0.0, 1.0)
            b = jnp.clip(f * b, 0.0, 1.0)
        elif op == 1:                   # contrast: blend(img, mean(gray(img)), f)
            f = params_ref[1]
            l = _rgb_to_gray(r, g, b)
            mean = jnp.mean(l, axis=-1, keepdims=True)     # per-frame mean
            r = _blend(r, mean, f)
            g = _blend(g, mean, f)
            b = _blend(b, mean, f)
        elif op == 2:                   # saturation: blend(img, gray(img), f)
            f = params_ref[2]
            l = _rgb_to_gray(r, g, b)
            r = _blend(r, l, f)
            g = _blend(g, l, f)
            b = _blend(b, l, f)
        else:                           # hue
            r, g, b = _adjust_hue(r, g, b, params_ref[3])
    return r, g, b


def _finalize_with_gray(params_ref, r, g, b, store3):
    """RandomGrayscale gated with pl.when: the rgb->gray math and the selects
    are skipped entirely in whichever branch is not taken (runtime flag,
    zero recompile cost)."""
    gray_on = params_ref[4] > 0.5

    @pl.when(gray_on)
    def _():
        l = _rgb_to_gray(r, g, b)
        store3(l, l, l)

    @pl.when(jnp.logical_not(gray_on))
    def _():
        store3(r, g, b)


# --------------------------------- kernels ----------------------------------

def _color_distort_kernel_lanes(params_ref, x_ref, o_ref, *, hw, order, apply_jitter):
    """Fast path (H*W % 128 == 0).

    params_ref : SMEM (5,) f32 = [brightness, contrast, saturation, hue, gray_flag]
    x_ref/o_ref: VMEM (tb, 3*HW) f32 — channels concatenated along the lane axis.
    Channel slices are lane-aligned; stores are full-lane unmasked slabs.
    """
    r = x_ref[:, 0 * hw:1 * hw]
    g = x_ref[:, 1 * hw:2 * hw]
    b = x_ref[:, 2 * hw:3 * hw]
    r, g, b = _jitter_ops(r, g, b, params_ref, order, apply_jitter)

    def store3(rr, gg, bb):
        o_ref[:, 0 * hw:1 * hw] = rr.astype(o_ref.dtype)
        o_ref[:, 1 * hw:2 * hw] = gg.astype(o_ref.dtype)
        o_ref[:, 2 * hw:3 * hw] = bb.astype(o_ref.dtype)

    _finalize_with_gray(params_ref, r, g, b, store3)


def _color_distort_kernel_chan(params_ref, x_ref, o_ref, *, order, apply_jitter):
    """Fallback path (H*W not a multiple of 128): block is (tb, 3, HW)."""
    r = x_ref[:, 0:1, :]
    g = x_ref[:, 1:2, :]
    b = x_ref[:, 2:3, :]
    r, g, b = _jitter_ops(r, g, b, params_ref, order, apply_jitter)

    def store3(rr, gg, bb):
        o_ref[:, 0:1, :] = rr.astype(o_ref.dtype)
        o_ref[:, 1:2, :] = gg.astype(o_ref.dtype)
        o_ref[:, 2:3, :] = bb.astype(o_ref.dtype)

    _finalize_with_gray(params_ref, r, g, b, store3)


# ------------------------------ tiling / wrapper -----------------------------

def _pick_frame_block(T, C, HW, bytes_per_elem=4, tile_budget=4 << 20):
    """Frame block sized against the *real* VMEM footprint: in + out, each
    double-buffered (4x the tile), plus the 8/3 sublane padding when the
    channel-blocked fallback layout is used.  Rounded to a multiple of 8 (or
    the full extent) and capped so the grid keeps >= 2 steps for v7x's two
    TensorCores.  4 MiB/tile => <= ~20 MiB live, safe on every generation."""
    lane_path = (HW % 128 == 0)
    pad = 1.0 if lane_path else 8.0 / 3.0
    per_frame = max(int(C * HW * bytes_per_elem * pad), 1)
    tb = max(1, tile_budget // per_frame)
    if T > 8:
        tb = min(tb, -(-T // 2))          # >= 2 grid steps (v7x megacore split)
    tb = min(tb, T)
    if tb < 8:
        tb = T if T < 8 else 8            # full-extent or sublane-full block
    else:
        tb = (tb // 8) * 8
    return int(tb)


@partial(jax.jit, static_argnames=("order", "apply_jitter", "frame_block"))
def _apply_color_distortion(video, params, order, apply_jitter, frame_block):
    T, C, H, W = video.shape
    HW = H * W
    tb = frame_block
    lane_path = (HW % 128 == 0)

    if lane_path:
        x = video.reshape(T, C * HW)                # free reshape, lane-dense
        kernel = partial(_color_distort_kernel_lanes, hw=HW,
                         order=order, apply_jitter=apply_jitter)
        block = (tb, C * HW)
        index_map = lambda i: (i, 0)
        pad_factor = 1.0
    else:
        x = video.reshape(T, C, HW)
        kernel = partial(_color_distort_kernel_chan,
                         order=order, apply_jitter=apply_jitter)
        block = (tb, C, HW)
        index_map = lambda i: (i, 0, 0)
        pad_factor = 8.0 / 3.0                      # C=3 pads to 8 sublanes

    # in + out, each double-buffered, plus headroom; fits v5e/v6e/v7x.
    tile_bytes = int(tb * C * HW * video.dtype.itemsize * pad_factor)
    vmem_limit = int(min(max(32 << 20, 4 * tile_bytes + (4 << 20)), 48 << 20))

    out = pl.pallas_call(
        kernel,
        out_shape=jax.ShapeDtypeStruct(x.shape, video.dtype),
        grid=(pl.cdiv(T, tb),),
        in_specs=[
            pl.BlockSpec(memory_space=pltpu.MemorySpace.SMEM),   # scalar params
            pl.BlockSpec(block, index_map),                      # video block
        ],
        out_specs=pl.BlockSpec(block, index_map),
        compiler_params=pltpu.CompilerParams(
            dimension_semantics=("parallel",),
            vmem_limit_bytes=vmem_limit),
    )(params, x)
    return out.reshape(T, C, H, W)


# ------------------------------- module port --------------------------------

class RandomApplyColorDistortion:
    """JAX/Pallas port of the PyTorch RandomApplyColorDistortion transform."""

    def __init__(self, p_gray_scale=0.0, p_color_jitter=0.0, s=1.0):
        assert 0 <= p_color_jitter <= 1 and 0 <= p_gray_scale <= 1, \
            (p_color_jitter, p_gray_scale)
        self.p_gray_scale = p_gray_scale
        self.p_color_jitter = p_color_jitter
        self.s = s
        jit_amt = 0.8 * s
        self.brightness = (max(0.0, 1.0 - jit_amt), 1.0 + jit_amt)
        self.contrast = (max(0.0, 1.0 - jit_amt), 1.0 + jit_amt)
        self.saturation = (max(0.0, 1.0 - jit_amt), 1.0 + jit_amt)
        self.hue = (-0.2 * s, 0.2 * s)
        assert 0.2 * s <= 0.5, "hue jitter must be <= 0.5"
        self._last_params = None

    def _sample_params(self):
        # TODO(synk): host-side Python RNG mirrors torchvision's sampling logic
        # (RandomApply coin flip, ColorJitter.get_params permutation + factors,
        # RandomGrayscale coin flip) but does not reproduce torch's exact RNG stream.
        apply_jitter = random.random() < self.p_color_jitter
        order = tuple(random.sample(range(4), 4))
        factors = (random.uniform(*self.brightness),
                   random.uniform(*self.contrast),
                   random.uniform(*self.saturation),
                   random.uniform(*self.hue))
        apply_gray = random.random() < self.p_gray_scale
        return dict(apply_jitter=apply_jitter, order=order,
                    factors=factors, apply_gray=apply_gray)

    def forward(self, item):
        video = jnp.asarray(item["video"], jnp.float32)      # (T, C, H, W) in [0,1]
        T, C, H, W = video.shape
        assert C == 3, "color jitter / grayscale require 3 channels"

        p = self._sample_params()
        # Canonicalize the (unused) order when jitter is off so the no-jitter
        # kernel compiles exactly once instead of up to 24 times.
        order = p["order"] if p["apply_jitter"] else (0, 1, 2, 3)
        p = dict(p, order=order)
        self._last_params = p

        params = jnp.array([p["factors"][0], p["factors"][1], p["factors"][2],
                            p["factors"][3], 1.0 if p["apply_gray"] else 0.0],
                           dtype=jnp.float32)
        frame_block = _pick_frame_block(T, C, H * W)
        item["video"] = _apply_color_distortion(
            video, params, order=order, apply_jitter=p["apply_jitter"],
            frame_block=frame_block)
        return item

    __call__ = forward


# ---------------------------- numpy reference --------------------------------

def _np_gray(r, g, b):
    return (np.float32(0.2989) * r + np.float32(0.587) * g
            + np.float32(0.114) * b).astype(np.float32)


def _np_blend(i1, i2, ratio):
    ratio = np.float32(ratio)
    return np.clip(ratio * i1 + (np.float32(1.0) - ratio) * i2,
                   0.0, 1.0).astype(np.float32)


def _np_floor_mod1(x):
    return (x - np.floor(x)).astype(np.float32)


def _np_adjust_hue(r, g, b, hue_factor):
    hue_factor = np.float32(hue_factor)
    maxc = np.maximum(np.maximum(r, g), b)
    minc = np.minimum(np.minimum(r, g), b)
    v = maxc
    cr = maxc - minc
    eqc = maxc == minc
    ones = np.ones_like(maxc)
    maxc_safe = np.where(eqc, ones, maxc)
    cr_safe = np.where(eqc, ones, cr)
    s = (cr / maxc_safe).astype(np.float32)
    inv_cr = (np.float32(1.0) / cr_safe).astype(np.float32)
    rc = (maxc - r) * inv_cr
    gc = (maxc - g) * inv_cr
    bc = (maxc - b) * inv_cr
    hr = np.where(maxc == r, bc - gc, np.float32(0.0))
    hg = np.where((maxc == g) & (maxc != r), np.float32(2.0) + rc - bc, np.float32(0.0))
    hb = np.where((maxc != g) & (maxc != r), np.float32(4.0) + gc - rc, np.float32(0.0))
    h = _np_floor_mod1((hr + hg + hb) * np.float32(1.0 / 6.0) + np.float32(1.0))
    h = _np_floor_mod1(h + hue_factor)
    h6 = h * np.float32(6.0)
    i_f = np.floor(h6).astype(np.float32)
    f = (h6 - i_f).astype(np.float32)
    i_f = np.where(i_f >= np.float32(6.0), i_f - np.float32(6.0), i_f)
    p = (v * (np.float32(1.0) - s)).astype(np.float32)
    q = (v * (np.float32(1.0) - s * f)).astype(np.float32)
    t = (v * (np.float32(1.0) - s * (np.float32(1.0) - f))).astype(np.float32)
    masks = [i_f == np.float32(k) for k in range(5)]

    def pick(vals):
        out = vals[5]
        for k in range(4, -1, -1):
            out = np.where(masks[k], vals[k], out)
        return out.astype(np.float32)

    return pick((v, q, p, p, t, v)), pick((t, v, v, q, p, p)), pick((p, p, t, v, v, q))


def _np_reference(video, order, factors, apply_jitter, apply_gray):
    x = np.asarray(video, dtype=np.float32)
    r, g, b = x[:, 0:1], x[:, 1:2], x[:, 2:3]
    if apply_jitter:
        for op in order:
            if op == 0:
                f = np.float32(factors[0])
                r = np.clip(f * r, 0.0, 1.0).astype(np.float32)
                g = np.clip(f * g, 0.0, 1.0).astype(np.float32)
                b = np.clip(f * b, 0.0, 1.0).astype(np.float32)
            elif op == 1:
                f = factors[1]
                mean = _np_gray(r, g, b).mean(axis=(1, 2, 3), keepdims=True).astype(np.float32)
                r, g, b = _np_blend(r, mean, f), _np_blend(g, mean, f), _np_blend(b, mean, f)
            elif op == 2:
                f = factors[2]
                l = _np_gray(r, g, b)
                r, g, b = _np_blend(r, l, f), _np_blend(g, l, f), _np_blend(b, l, f)
            else:
                r, g, b = _np_adjust_hue(r, g, b, factors[3])
    if apply_gray:
        l = _np_gray(r, g, b)
        r, g, b = l, l, l
    return np.concatenate([r, g, b], axis=1)


# ----------------------------------- main ------------------------------------

if __name__ == "__main__":
    random.seed(0)
    key = jax.random.PRNGKey(0)

    # 1) fast path (H*W % 128 == 0): both distortions always applied
    T, C, H, W = 8, 3, 16, 16
    video = jax.random.uniform(key, (T, C, H, W), jnp.float32)
    xform = RandomApplyColorDistortion(p_gray_scale=1.0, p_color_jitter=1.0, s=1.0)
    out = xform.forward({"video": video})
    jax.block_until_ready(out["video"])
    assert out["video"].shape == (T, C, H, W)
    p = xform._last_params
    ref = _np_reference(np.asarray(video), p["order"], p["factors"],
                        p["apply_jitter"], p["apply_gray"])
    np.testing.assert_allclose(np.asarray(out["video"]), ref, rtol=1e-5, atol=1e-4)

    # 2) probability 0 -> exact pass-through (gray-off pl.when branch, no jitter)
    ident = RandomApplyColorDistortion(p_gray_scale=0.0, p_color_jitter=0.0, s=1.0)
    out2 = ident.forward({"video": video})
    jax.block_until_ready(out2["video"])
    np.testing.assert_array_equal(np.asarray(out2["video"]), np.asarray(video))

    # 3) jitter on, grayscale off at runtime (fast path, gray-off branch)
    xform3 = RandomApplyColorDistortion(p_gray_scale=0.0, p_color_jitter=1.0, s=0.5)
    out3 = xform3.forward({"video": video})
    jax.block_until_ready(out3["video"])
    p3 = xform3._last_params
    ref3 = _np_reference(np.asarray(video), p3["order"], p3["factors"],
                         p3["apply_jitter"], p3["apply_gray"])
    np.testing.assert_allclose(np.asarray(out3["video"]), ref3, rtol=1e-5, atol=1e-4)

    # 4) fallback path (H*W not a multiple of 128)
    T2, H2, W2 = 4, 12, 12
    video2 = jax.random.uniform(jax.random.PRNGKey(1), (T2, C, H2, W2), jnp.float32)
    xform4 = RandomApplyColorDistortion(p_gray_scale=1.0, p_color_jitter=1.0, s=1.0)
    out4 = xform4.forward({"video": video2})
    jax.block_until_ready(out4["video"])
    p4 = xform4._last_params
    ref4 = _np_reference(np.asarray(video2), p4["order"], p4["factors"],
                         p4["apply_jitter"], p4["apply_gray"])
    np.testing.assert_allclose(np.asarray(out4["video"]), ref4, rtol=1e-5, atol=1e-4)

    print("KERNEL_OK")
</pallas_src>

<mosaic_0001>
module attributes {stable_mosaic.version = 11 : i64} {
  func.func @_color_distort_kernel_lanes(%arg0: i32, %arg1: memref<5xf32, #tpu.memory_space<smem>>, %arg2: memref<8x768xf32, #tpu.memory_space<vmem>>, %arg3: memref<8x768xf32, #tpu.memory_space<vmem>>) attributes {dimension_semantics = [#tpu.dimension_semantics<parallel>], iteration_bounds = array<i64: 1>, scalar_prefetch = 0 : i64, scratch_operands = 0 : i64, tpu.core_type = #tpu.core_type<tc>, window_params = [{transform_indices = @transform_0, window_bounds = array<i64: 5>}, {transform_indices = @transform_1, window_bounds = array<i64: 8, 768>}, {transform_indices = @transform_2, window_bounds = array<i64: 8, 768>}]} {
    %c0 = arith.constant 0 : index
    %c0_0 = arith.constant 0 : index
    %0 = vector.load %arg2[%c0, %c0_0] : memref<8x768xf32, #tpu.memory_space<vmem>>, vector<8x256xf32>
    %c0_1 = arith.constant 0 : index
    %c256 = arith.constant 256 : index
    %1 = vector.load %arg2[%c0_1, %c256] : memref<8x768xf32, #tpu.memory_space<vmem>>, vector<8x256xf32>
    %c0_2 = arith.constant 0 : index
    %c512 = arith.constant 512 : index
    %2 = vector.load %arg2[%c0_2, %c512] : memref<8x768xf32, #tpu.memory_space<vmem>>, vector<8x256xf32>
    %c3 = arith.constant 3 : index
    %3 = memref.load %arg1[%c3] : memref<5xf32, #tpu.memory_space<smem>>
    %4 = arith.maximumf %0, %1 : vector<8x256xf32>
    %5 = arith.maximumf %4, %2 : vector<8x256xf32>
    %6 = arith.minimumf %0, %1 : vector<8x256xf32>
    %7 = arith.minimumf %6, %2 : vector<8x256xf32>
    %8 = arith.subf %5, %7 : vector<8x256xf32>
    %9 = arith.cmpf oeq, %5, %7 : vector<8x256xf32>
    %cst = arith.constant 1.000000e+00 : f32
    %10 = vector.broadcast %cst : f32 to vector<8x256xf32>
    %11 = arith.select %9, %10, %5 : vector<8x256xi1>, vector<8x256xf32>
    %12 = arith.select %9, %10, %8 : vector<8x256xi1>, vector<8x256xf32>
    %13 = arith.divf %8, %11 : vector<8x256xf32>
    %cst_3 = arith.constant 1.000000e+00 : f32
    %14 = vector.broadcast %cst_3 : f32 to vector<8x256xf32>
    %15 = arith.divf %14, %12 : vector<8x256xf32>
    %16 = arith.subf %5, %0 : vector<8x256xf32>
    %17 = arith.mulf %16, %15 : vector<8x256xf32>
    %18 = arith.subf %5, %1 : vector<8x256xf32>
    %19 = arith.mulf %18, %15 : vector<8x256xf32>
    %20 = arith.subf %5, %2 : vector<8x256xf32>
    %21 = arith.mulf %20, %15 : vector<8x256xf32>
    %22 = arith.cmpf oeq, %5, %0 : vector<8x256xf32>
    %23 = arith.subf %21, %19 : vector<8x256xf32>
    %cst_4 = arith.constant 0.000000e+00 : f32
    %24 = vector.broadcast %cst_4 : f32 to vector<8x256xf32>
    %25 = arith.select %22, %23, %24 : vector<8x256xi1>, vector<8x256xf32>
    %26 = arith.cmpf oeq, %5, %1 : vector<8x256xf32>
    %27 = arith.cmpf one, %5, %0 : vector<8x256xf32>
    %28 = arith.andi %26, %27 : vector<8x256xi1>
    %cst_5 = arith.constant 2.000000e+00 : f32
    %29 = vector.broadcast %cst_5 : f32 to vector<8x256xf32>
    %30 = arith.addf %29, %17 : vector<8x256xf32>
    %31 = arith.subf %30, %21 : vector<8x256xf32>
    %cst_6 = arith.constant 0.000000e+00 : f32
    %32 = vector.broadcast %cst_6 : f32 to vector<8x256xf32>
    %33 = arith.select %28, %31, %32 : vector<8x256xi1>, vector<8x256xf32>
    %34 = arith.cmpf one, %5, %1 : vector<8x256xf32>
    %35 = arith.cmpf one, %5, %0 : vector<8x256xf32>
    %36 = arith.andi %34, %35 : vector<8x256xi1>
    %cst_7 = arith.constant 4.000000e+00 : f32
    %37 = vector.broadcast %cst_7 : f32 to vector<8x256xf32>
    %38 = arith.addf %37, %19 : vector<8x256xf32>
    %39 = arith.subf %38, %17 : vector<8x256xf32>
    %cst_8 = arith.constant 0.000000e+00 : f32
    %40 = vector.broadcast %cst_8 : f32 to vector<8x256xf32>
    %41 = arith.select %36, %39, %40 : vector<8x256xi1>, vector<8x256xf32>
    %42 = arith.addf %25, %33 : vector<8x256xf32>
    %43 = arith.addf %42, %41 : vector<8x256xf32>
    %cst_9 = arith.constant 0.166666672 : f32
    %44 = vector.broadcast %cst_9 : f32 to vector<8x256xf32>
    %45 = arith.mulf %43, %44 : vector<8x256xf32>
    %cst_10 = arith.constant 1.000000e+00 : f32
    %46 = vector.broadcast %cst_10 : f32 to vector<8x256xf32>
    %47 = arith.addf %45, %46 : vector<8x256xf32>
    %48 = math.floor %47 : vector<8x256xf32>
    %49 = arith.subf %47, %48 : vector<8x256xf32>
    %50 = vector.broadcast %3 : f32 to vector<8x256xf32>
    %51 = arith.addf %49, %50 : vector<8x256xf32>
    %52 = math.floor %51 : vector<8x256xf32>
    %53 = arith.subf %51, %52 : vector<8x256xf32>
    %cst_11 = arith.constant 6.000000e+00 : f32
    %54 = vector.broadcast %cst_11 : f32 to vector<8x256xf32>
    %55 = arith.mulf %53, %54 : vector<8x256xf32>
    %56 = math.floor %55 : vector<8x256xf32>
    %57 = arith.subf %55, %56 : vector<8x256xf32>
    %cst_12 = arith.constant 6.000000e+00 : f32
    %58 = vector.broadcast %cst_12 : f32 to vector<8x256xf32>
    %59 = arith.cmpf oge, %56, %58 : vector<8x256xf32>
    %cst_13 = arith.constant 6.000000e+00 : f32
    %60 = vector.broadcast %cst_13 : f32 to vector<8x256xf32>
    %61 = arith.subf %56, %60 : vector<8x256xf32>
    %62 = arith.select %59, %61, %56 : vector<8x256xi1>, vector<8x256xf32>
    %cst_14 = arith.constant 1.000000e+00 : f32
    %63 = vector.broadcast %cst_14 : f32 to vector<8x256xf32>
    %64 = arith.subf %63, %13 : vector<8x256xf32>
    %65 = arith.mulf %5, %64 : vector<8x256xf32>
    %66 = arith.mulf %13, %57 : vector<8x256xf32>
    %cst_15 = arith.constant 1.000000e+00 : f32
    %67 = vector.broadcast %cst_15 : f32 to vector<8x256xf32>
    %68 = arith.subf %67, %66 : vector<8x256xf32>
    %69 = arith.mulf %5, %68 : vector<8x256xf32>
    %cst_16 = arith.constant 1.000000e+00 : f32
    %70 = vector.broadcast %cst_16 : f32 to vector<8x256xf32>
    %71 = arith.subf %70, %57 : vector<8x256xf32>
    %72 = arith.mulf %13, %71 : vector<8x256xf32>
    %cst_17 = arith.constant 1.000000e+00 : f32
    %73 = vector.broadcast %cst_17 : f32 to vector<8x256xf32>
    %74 = arith.subf %73, %72 : vector<8x256xf32>
    %75 = arith.mulf %5, %74 : vector<8x256xf32>
    %cst_18 = arith.constant 0.000000e+00 : f32
    %76 = vector.broadcast %cst_18 : f32 to vector<8x256xf32>
    %77 = arith.cmpf oeq, %62, %76 : vector<8x256xf32>
    %cst_19 = arith.constant 1.000000e+00 : f32
    %78 = vector.broadcast %cst_19 : f32 to vector<8x256xf32>
    %79 = arith.cmpf oeq, %62, %78 : vector<8x256xf32>
    %cst_20 = arith.constant 2.000000e+00 : f32
    %80 = vector.broadcast %cst_20 : f32 to vector<8x256xf32>
    %81 = arith.cmpf oeq, %62, %80 : vector<8x256xf32>
    %cst_21 = arith.constant 3.000000e+00 : f32
    %82 = vector.broadcast %cst_21 : f32 to vector<8x256xf32>
    %83 = arith.cmpf oeq, %62, %82 : vector<8x256xf32>
    %cst_22 = arith.constant 4.000000e+00 : f32
    %84 = vector.broadcast %cst_22 : f32 to vector<8x256xf32>
    %85 = arith.cmpf oeq, %62, %84 : vector<8x256xf32>
    %86 = arith.select %85, %75, %5 : vector<8x256xi1>, vector<8x256xf32>
    %87 = arith.select %83, %65, %86 : vector<8x256xi1>, vector<8x256xf32>
    %88 = arith.select %81, %65, %87 : vector<8x256xi1>, vector<8x256xf32>
    %89 = arith.select %79, %69, %88 : vector<8x256xi1>, vector<8x256xf32>
    %90 = arith.select %77, %5, %89 : vector<8x256xi1>, vector<8x256xf32>
    %91 = arith.select %85, %65, %65 : vector<8x256xi1>, vector<8x256xf32>
    %92 = arith.select %83, %69, %91 : vector<8x256xi1>, vector<8x256xf32>
    %93 = arith.select %81, %5, %92 : vector<8x256xi1>, vector<8x256xf32>
    %94 = arith.select %79, %5, %93 : vector<8x256xi1>, vector<8x256xf32>
    %95 = arith.select %77, %75, %94 : vector<8x256xi1>, vector<8x256xf32>
    %96 = arith.select %85, %5, %69 : vector<8x256xi1>, vector<8x256xf32>
    %97 = arith.select %83, %5, %96 : vector<8x256xi1>, vector<8x256xf32>
    %98 = arith.select %81, %75, %97 : vector<8x256xi1>, vector<8x256xf32>
    %99 = arith.select %79, %65, %98 : vector<8x256xi1>, vector<8x256xf32>
    %100 = arith.select %77, %65, %99 : vector<8x256xi1>, vector<8x256xf32>
    %c0_23 = arith.constant 0 : index
    %101 = memref.load %arg1[%c0_23] : memref<5xf32, #tpu.memory_space<smem>>
    %102 = vector.broadcast %101 : f32 to vector<8x256xf32>
    %103 = arith.mulf %102, %90 : vector<8x256xf32>
    %cst_24 = arith.constant 0.000000e+00 : f32
    %cst_25 = arith.constant 1.000000e+00 : f32
    %104 = vector.broadcast %cst_24 : f32 to vector<8x256xf32>
    %105 = arith.maximumf %104, %103 : vector<8x256xf32>
    %106 = vector.broadcast %cst_25 : f32 to vector<8x256xf32>
    %107 = arith.minimumf %106, %105 : vector<8x256xf32>
    %108 = vector.broadcast %101 : f32 to vector<8x256xf32>
    %109 = arith.mulf %108, %95 : vector<8x256xf32>
    %cst_26 = arith.constant 0.000000e+00 : f32
    %cst_27 = arith.constant 1.000000e+00 : f32
    %110 = vector.broadcast %cst_26 : f32 to vector<8x256xf32>
    %111 = arith.maximumf %110, %109 : vector<8x256xf32>
    %112 = vector.broadcast %cst_27 : f32 to vector<8x256xf32>
    %113 = arith.minimumf %112, %111 : vector<8x256xf32>
    %114 = vector.broadcast %101 : f32 to vector<8x256xf32>
    %115 = arith.mulf %114, %100 : vector<8x256xf32>
    %cst_28 = arith.constant 0.000000e+00 : f32
    %cst_29 = arith.constant 1.000000e+00 : f32
    %116 = vector.broadcast %cst_28 : f32 to vector<8x256xf32>
    %117 = arith.maximumf %116, %115 : vector<8x256xf32>
    %118 = vector.broadcast %cst_29 : f32 to vector<8x256xf32>
    %119 = arith.minimumf %118, %117 : vector<8x256xf32>
    %c1 = arith.constant 1 : index
    %120 = memref.load %arg1[%c1] : memref<5xf32, #tpu.memory_space<smem>>
    %cst_30 = arith.constant 2.989000e-01 : f32
    %121 = vector.broadcast %cst_30 : f32 to vector<8x256xf32>
    %122 = arith.mulf %121, %107 : vector<8x256xf32>
    %cst_31 = arith.constant 5.870000e-01 : f32
    %123 = vector.broadcast %cst_31 : f32 to vector<8x256xf32>
    %124 = arith.mulf %123, %113 : vector<8x256xf32>
    %125 = arith.addf %122, %124 : vector<8x256xf32>
    %cst_32 = arith.constant 1.140000e-01 : f32
    %126 = vector.broadcast %cst_32 : f32 to vector<8x256xf32>
    %127 = arith.mulf %126, %119 : vector<8x256xf32>
    %128 = arith.addf %125, %127 : vector<8x256xf32>
    %cst_33 = arith.constant dense<0.000000e+00> : vector<8xf32>
    %129 = vector.multi_reduction <add>, %128, %cst_33 [1] : vector<8x256xf32> to vector<8xf32>
    %130 = vector.shape_cast %129 : vector<8xf32> to vector<8x1xf32>
    %cst_34 = arith.constant 2.560000e+02 : f32
    %131 = vector.broadcast %cst_34 : f32 to vector<8x1xf32>
    %132 = arith.divf %130, %131 : vector<8x1xf32>
    %133 = vector.broadcast %120 : f32 to vector<8x256xf32>
    %134 = arith.mulf %133, %107 : vector<8x256xf32>
    %cst_35 = arith.constant 1.000000e+00 : f32
    %135 = arith.subf %cst_35, %120 : f32
    %136 = vector.broadcast %135 : f32 to vector<8x1xf32>
    %137 = arith.mulf %136, %132 : vector<8x1xf32>
    %138 = vector.broadcast %137 : vector<8x1xf32> to vector<8x256xf32>
    %139 = arith.addf %134, %138 : vector<8x256xf32>
    %cst_36 = arith.constant 0.000000e+00 : f32
    %cst_37 = arith.constant 1.000000e+00 : f32
    %140 = vector.broadcast %cst_36 : f32 to vector<8x256xf32>
    %141 = arith.maximumf %140, %139 : vector<8x256xf32>
    %142 = vector.broadcast %cst_37 : f32 to vector<8x256xf32>
    %143 = arith.minimumf %142, %141 : vector<8x256xf32>
    %144 = vector.broadcast %120 : f32 to vector<8x256xf32>
    %145 = arith.mulf %144, %113 : vector<8x256xf32>
    %cst_38 = arith.constant 1.000000e+00 : f32
    %146 = arith.subf %cst_38, %120 : f32
    %147 = vector.broadcast %146 : f32 to vector<8x1xf32>
    %148 = arith.mulf %147, %132 : vector<8x1xf32>
    %149 = vector.broadcast %148 : vector<8x1xf32> to vector<8x256xf32>
    %150 = arith.addf %145, %149 : vector<8x256xf32>
    %cst_39 = arith.constant 0.000000e+00 : f32
    %cst_40 = arith.constant 1.000000e+00 : f32
    %151 = vector.broadcast %cst_39 : f32 to vector<8x256xf32>
    %152 = arith.maximumf %151, %150 : vector<8x256xf32>
    %153 = vector.broadcast %cst_40 : f32 to vector<8x256xf32>
    %154 = arith.minimumf %153, %152 : vector<8x256xf32>
    %155 = vector.broadcast %120 : f32 to vector<8x256xf32>
    %156 = arith.mulf %155, %119 : vector<8x256xf32>
    %cst_41 = arith.constant 1.000000e+00 : f32
    %157 = arith.subf %cst_41, %120 : f32
    %158 = vector.broadcast %157 : f32 to vector<8x1xf32>
    %159 = arith.mulf %158, %132 : vector<8x1xf32>
    %160 = vector.broadcast %159 : vector<8x1xf32> to vector<8x256xf32>
    %161 = arith.addf %156, %160 : vector<8x256xf32>
    %cst_42 = arith.constant 0.000000e+00 : f32
    %cst_43 = arith.constant 1.000000e+00 : f32
    %162 = vector.broadcast %cst_42 : f32 to vector<8x256xf32>
    %163 = arith.maximumf %162, %161 : vector<8x256xf32>
    %164 = vector.broadcast %cst_43 : f32 to vector<8x256xf32>
    %165 = arith.minimumf %164, %163 : vector<8x256xf32>
    %c2 = arith.constant 2 : index
    %166 = memref.load %arg1[%c2] : memref<5xf32, #tpu.memory_space<smem>>
    %cst_44 = arith.constant 2.989000e-01 : f32
    %167 = vector.broadcast %cst_44 : f32 to vector<8x256xf32>
    %168 = arith.mulf %167, %143 : vector<8x256xf32>
    %cst_45 = arith.constant 5.870000e-01 : f32
    %169 = vector.broadcast %cst_45 : f32 to vector<8x256xf32>
    %170 = arith.mulf %169, %154 : vector<8x256xf32>
    %171 = arith.addf %168, %170 : vector<8x256xf32>
    %cst_46 = arith.constant 1.140000e-01 : f32
    %172 = vector.broadcast %cst_46 : f32 to vector<8x256xf32>
    %173 = arith.mulf %172, %165 : vector<8x256xf32>
    %174 = arith.addf %171, %173 : vector<8x256xf32>
    %175 = vector.broadcast %166 : f32 to vector<8x256xf32>
    %176 = arith.mulf %175, %143 : vector<8x256xf32>
    %cst_47 = arith.constant 1.000000e+00 : f32
    %177 = arith.subf %cst_47, %166 : f32
    %178 = vector.broadcast %177 : f32 to vector<8x256xf32>
    %179 = arith.mulf %178, %174 : vector<8x256xf32>
    %180 = arith.addf %176, %179 : vector<8x256xf32>
    %cst_48 = arith.constant 0.000000e+00 : f32
    %cst_49 = arith.constant 1.000000e+00 : f32
    %181 = vector.broadcast %cst_48 : f32 to vector<8x256xf32>
    %182 = arith.maximumf %181, %180 : vector<8x256xf32>
    %183 = vector.broadcast %cst_49 : f32 to vector<8x256xf32>
    %184 = arith.minimumf %183, %182 : vector<8x256xf32>
    %185 = vector.broadcast %166 : f32 to vector<8x256xf32>
    %186 = arith.mulf %185, %154 : vector<8x256xf32>
    %cst_50 = arith.constant 1.000000e+00 : f32
    %187 = arith.subf %cst_50, %166 : f32
    %188 = vector.broadcast %187 : f32 to vector<8x256xf32>
    %189 = arith.mulf %188, %174 : vector<8x256xf32>
    %190 = arith.addf %186, %189 : vector<8x256xf32>
    %cst_51 = arith.constant 0.000000e+00 : f32
    %cst_52 = arith.constant 1.000000e+00 : f32
    %191 = vector.broadcast %cst_51 : f32 to vector<8x256xf32>
    %192 = arith.maximumf %191, %190 : vector<8x256xf32>
    %193 = vector.broadcast %cst_52 : f32 to vector<8x256xf32>
    %194 = arith.minimumf %193, %192 : vector<8x256xf32>
    %195 = vector.broadcast %166 : f32 to vector<8x256xf32>
    %196 = arith.mulf %195, %165 : vector<8x256xf32>
    %cst_53 = arith.constant 1.000000e+00 : f32
    %197 = arith.subf %cst_53, %166 : f32
    %198 = vector.broadcast %197 : f32 to vector<8x256xf32>
    %199 = arith.mulf %198, %174 : vector<8x256xf32>
    %200 = arith.addf %196, %199 : vector<8x256xf32>
    %cst_54 = arith.constant 0.000000e+00 : f32
    %cst_55 = arith.constant 1.000000e+00 : f32
    %201 = vector.broadcast %cst_54 : f32 to vector<8x256xf32>
    %202 = arith.maximumf %201, %200 : vector<8x256xf32>
    %203 = vector.broadcast %cst_55 : f32 to vector<8x256xf32>
    %204 = arith.minimumf %203, %202 : vector<8x256xf32>
    %c4 = arith.constant 4 : index
    %205 = memref.load %arg1[%c4] : memref<5xf32, #tpu.memory_space<smem>>
    %cst_56 = arith.constant 5.000000e-01 : f32
    %206 = arith.cmpf ogt, %205, %cst_56 : f32
    %207 = arith.extui %206 : i1 to i32
    %c0_i32 = arith.constant 0 : i32
    %208 = arith.cmpi ne, %207, %c0_i32 : i32
    scf.if %208 {
      %cst_58 = arith.constant 2.989000e-01 : f32
      %212 = vector.broadcast %cst_58 : f32 to vector<8x256xf32>
      %213 = arith.mulf %212, %184 : vector<8x256xf32>
      %cst_59 = arith.constant 5.870000e-01 : f32
      %214 = vector.broadcast %cst_59 : f32 to vector<8x256xf32>
      %215 = arith.mulf %214, %194 : vector<8x256xf32>
      %216 = arith.addf %213, %215 : vector<8x256xf32>
      %cst_60 = arith.constant 1.140000e-01 : f32
      %217 = vector.broadcast %cst_60 : f32 to vector<8x256xf32>
      %218 = arith.mulf %217, %204 : vector<8x256xf32>
      %219 = arith.addf %216, %218 : vector<8x256xf32>
      %c0_61 = arith.constant 0 : index
      %c0_62 = arith.constant 0 : index
      %220 = vector.load %arg3[%c0_61, %c0_62] : memref<8x768xf32, #tpu.memory_space<vmem>>, vector<8x256xf32>
      tpu.vector_store %arg3[%c0_61, %c0_62], %219 {strides = array<i32>} : memref<8x768xf32, #tpu.memory_space<vmem>>, vector<8x256xf32>,
      %c0_63 = arith.constant 0 : index
      %c256_64 = arith.constant 256 : index
      %221 = vector.load %arg3[%c0_63, %c256_64] : memref<8x768xf32, #tpu.memory_space<vmem>>, vector<8x256xf32>
      tpu.vector_store %arg3[%c0_63, %c256_64], %219 {strides = array<i32>} : memref<8x768xf32, #tpu.memory_space<vmem>>, vector<8x256xf32>,
      %c0_65 = arith.constant 0 : index
      %c512_66 = arith.constant 512 : index
      %222 = vector.load %arg3[%c0_65, %c512_66] : memref<8x768xf32, #tpu.memory_space<vmem>>, vector<8x256xf32>
      tpu.vector_store %arg3[%c0_65, %c512_66], %219 {strides = array<i32>} : memref<8x768xf32, #tpu.memory_space<vmem>>, vector<8x256xf32>,
    } else {
    }
    %true = arith.constant true
    %209 = arith.xori %206, %true : i1
    %210 = arith.extui %209 : i1 to i32
    %c0_i32_57 = arith.constant 0 : i32
    %211 = arith.cmpi ne, %210, %c0_i32_57 : i32
    scf.if %211 {
      %c0_58 = arith.constant 0 : index
      %c0_59 = arith.constant 0 : index
      %212 = vector.load %arg3[%c0_58, %c0_59] : memref<8x768xf32, #tpu.memory_space<vmem>>, vector<8x256xf32>
      tpu.vector_store %arg3[%c0_58, %c0_59], %184 {strides = array<i32>} : memref<8x768xf32, #tpu.memory_space<vmem>>, vector<8x256xf32>,
      %c0_60 = arith.constant 0 : index
      %c256_61 = arith.constant 256 : index
      %213 = vector.load %arg3[%c0_60, %c256_61] : memref<8x768xf32, #tpu.memory_space<vmem>>, vector<8x256xf32>
      tpu.vector_store %arg3[%c0_60, %c256_61], %194 {strides = array<i32>} : memref<8x768xf32, #tpu.memory_space<vmem>>, vector<8x256xf32>,
      %c0_62 = arith.constant 0 : index
      %c512_63 = arith.constant 512 : index
      %214 = vector.load %arg3[%c0_62, %c512_63] : memref<8x768xf32, #tpu.memory_space<vmem>>, vector<8x256xf32>
      tpu.vector_store %arg3[%c0_62, %c512_63], %204 {strides = array<i32>} : memref<8x768xf32, #tpu.memory_space<vmem>>, vector<8x256xf32>,
    } else {
    }
    return
  }
  func.func @transform_0(%arg0: i32) -> i32 {
    %c0_i32 = arith.constant 0 : i32
    %c0_i32_0 = arith.constant 0 : i32
    return %c0_i32 : i32
  }
  func.func @transform_1(%arg0: i32) -> (i32, i32) {
    %c0_i32 = arith.constant 0 : i32
    %c0_i32_0 = arith.constant 0 : i32
    return %arg0, %c0_i32 : i32, i32
  }
  func.func @transform_2(%arg0: i32) -> (i32, i32) {
    %c0_i32 = arith.constant 0 : i32
    %c0_i32_0 = arith.constant 0 : i32
    return %arg0, %c0_i32 : i32, i32
  }
}

</mosaic_0001>

<bundles_post_ra>
// kernel: _apply_color_distortion.1
= control target key start
LH: loop header
LB: loop body
LE: loop exit
PB: predicated region body
PF: predicated region fallthrough
CT: control target
= control target key end

     0   :  { %7 = vsyncpa [#allocation3], 0  ;;  %s546_s0 = inlined_call_operand.vmem [shape: f32[5], index: 0, kind: input, shape index: {}]   ;;  %s547_s1 = inlined_call_operand.vmem [shape: f32[8,768], index: 1, kind: input, shape index: {}]   ;;  %s548_s2 = inlined_call_operand.vmem [shape: f32[8,768], index: 2, kind: output, shape index: {}]  }
   0x1   :  { %s14_s11 = sshll.u32 %s546_s0, 4  ;;  %s15_s11 = int_to_ptr.vmem [resolvable:$true] %s14_s11 }
   0x2   :  { %s336_s12 = scalar_lea.vmem %s15_s11, 16  ;;  %p341_p1 = scmp.lt.s32.totalorder %s15_s11, %s15_s11 }
   0x3   :  { %p337_p0 = scmp.ne.s32.totalorder %s15_s11, %s336_s12  ;;  %p342_p2 = scmp.lt.s32.totalorder %s336_s12, %s336_s12 }
   0x5   :  { %p343_p3 = por %p342_p2, %p341_p1 }
   0x7   :  { %p344_p4 = pnand %p343_p3, %p337_p0 }
   0x9   :  { %347 = shalt.err (!%p344_p4)
}
   0xa   :  { %s350_s13 = smov [#allocation2]  }
   0xb   :  { %17 = dma.vmem_to_smem %s15_s11, 16, %s350_s13, [#allocation3]  }
   0xc   :  { %348 = dma.done.wait [#allocation3], 16  }
   0xd   :  { %349 = vsyncadd [#allocation3], 4294967280 }
   0xe   :  { %23 = sfence }
   0xf   :  { %v24_v0 = vld [vmem:[%s547_s1] sm:$0xff]  ;;  %v25_v1 = vld [vmem:[%s547_s1 + $0x8] sm:$0xff]  ;;  %v26_v2 = vld [vmem:[%s547_s1 + $0x10] sm:$0xff]  ;;  %s182_s25 = sld [smem:[#allocation2]]  ;;  %s499_s26 = sld [smem:[#allocation2 + $0x4]] }
  0x10   :  { %v27_v3 = vld [vmem:[%s547_s1 + $0x18] sm:$0xff]  ;;  %v28_v4 = vld [vmem:[%s547_s1 + $0x20] sm:$0xff]  ;;  %v29_v5 = vld [vmem:[%s547_s1 + $0x28] sm:$0xff]  ;;  %v31_v6 = vmax.f32 %v24_v0, %v26_v2  ;;  %v35_v7 = vmin.f32 %v24_v0, %v26_v2  ;;  %s321_s1 = sld [smem:[#allocation2 + $0x3]]  ;;  %s324_s27 = sld [smem:[#allocation2 + $0x1]] }
  0x11   :  { %v32_v8 = vmax.f32 %v25_v1, %v27_v3  ;;  %v36_v9 = vmin.f32 %v25_v1, %v27_v3  ;;  %s502_s29 = sld [smem:[#allocation2 + $0x2]] }
  0x12   :  { %v387_v10 = vmax.f32 %v31_v6, %v28_v4  ;;  %v37_v11 = vmin.f32 %v35_v7, %v28_v4 }
  0x13   :  { %v389_v12 = vmax.f32 %v32_v8, %v29_v5  ;;  %v38_v13 = vmin.f32 %v36_v9, %v29_v5 }
  0x14   :  { %v392_v14 = vsub.f32 %v387_v10, %v37_v11  ;;  %vm41_vm0 = vcmp.eq.f32.partialorder %v387_v10, %v37_v11  ;;  %v55_v18 = vsub.f32 %v387_v10, %v24_v0  ;;  %v59_v19 = vsub.f32 %v387_v10, %v26_v2 }
  0x15   :  { %v396_v15 = vsub.f32 %v389_v12, %v38_v13  ;;  %vm42_vm1 = vcmp.eq.f32.partialorder %v389_v12, %v38_v13  ;;  %v63_v20 = vsub.f32 %v387_v10, %v28_v4  ;;  %v56_v21 = vsub.f32 %v389_v12, %v25_v1  ;;  %p287_p5 = scmp.gt.f32.partialorder %s499_s26, 0.5 }
  0x16   :  { %v45_v16 = vsel %vm41_vm0, 1.0, %v392_v14  ;;  %v60_v22 = vsub.f32 %v389_v12, %v27_v3  ;;  %v64_v23 = vsub.f32 %v389_v12, %v29_v5  ;;  %vm73_vm2 = vcmp.eq.f32.partialorder %v387_v10, %v26_v2  ;;  %s221_s28 = ssub.f32 1.0, %s324_s27 }
  0x17   :  { %v46_v17 = vsel %vm42_vm1, 1.0, %v396_v15  ;;  %328 = vrcp.f32 %v45_v16  ;;  %vm75_vm3 = vcmp.ne.f32.partialorder %v387_v10, %v24_v0  ;;  %vm67_vm4 = vcmp.eq.f32.partialorder %v387_v10, %v24_v0  ;;  %s260_s30 = ssub.f32 1.0, %s502_s29 }
  0x18   :  { %330 = vrcp.f32 %v46_v17  ;;  %vm74_vm5 = vcmp.eq.f32.partialorder %v389_v12, %v27_v3  ;;  %vm76_vm6 = vcmp.ne.f32.partialorder %v389_v12, %v25_v1  ;;  %vm85_vm7 = vcmp.ne.f32.partialorder %v387_v10, %v26_v2  ;;  %vm419_vm8 = vmand %vm73_vm2, %vm75_vm3 }
  0x19   :  { %vm86_vm9 = vcmp.ne.f32.partialorder %v389_v12, %v27_v3  ;;  %vm68_vm10 = vcmp.eq.f32.partialorder %v389_v12, %v25_v1  ;;  %vm427_vm11 = vmand %vm74_vm5, %vm76_vm6  ;;  %v43_v51 = vsel %vm41_vm0, 1.0, %v387_v10  ;;  %v44_v53 = vsel %vm42_vm1, 1.0, %v389_v12 }
  0x1a   :  { %vm87_vm12 = vmand %vm85_vm7, %vm75_vm3  ;;  %332 = vrcp.f32 %v43_v51  ;;  %v107_v62 = vstv %s321_s1 }
  0x1b   :  { %vm88_vm13 = vmand %vm86_vm9, %vm76_vm6  ;;  %334 = vrcp.f32 %v44_v53 }
  0x21   :  { %v329_v24 = vpop.eup %328 }
  0x22   :  { %v331_v25 = vpop.eup %330  ;;  %v57_v26 = vmul.f32 %v329_v24, %v55_v18  ;;  %v61_v27 = vmul.f32 %v329_v24, %v59_v19  ;;  %v65_v28 = vmul.f32 %v329_v24, %v63_v20 }
  0x23   :  { %v58_v29 = vmul.f32 %v331_v25, %v56_v21  ;;  %v62_v30 = vmul.f32 %v331_v25, %v60_v22  ;;  %v66_v31 = vmul.f32 %v331_v25, %v64_v23  ;;  %v449_v23 = vstv %s182_s25 }
  0x24   :  { %v69_v33 = vsub.f32 %v65_v28, %v61_v27  ;;  %v79_v35 = vadd.f32 2.0, %v57_v26  ;;  %v89_v36 = vadd.f32 4.0, %v61_v27  ;;  %v333_v3 = vpop.eup %332 }
  0x25   :  { %v70_v37 = vsub.f32 %v66_v31, %v62_v30  ;;  %v80_v38 = vadd.f32 2.0, %v58_v29  ;;  %v90_v39 = vadd.f32 4.0, %v62_v30  ;;  %v335_v5 = vpop.eup %334  ;;  %v48_v8 = vmul.f32 %v333_v3, %v392_v14 }
  0x26   :  { %v71_v40 = vsel %vm67_vm4, %v69_v33, 0.0  ;;  %v81_v41 = vsub.f32 %v79_v35, %v65_v28  ;;  %v91_v42 = vsub.f32 %v89_v36, %v57_v26  ;;  %v50_v11 = vmul.f32 %v335_v5, %v396_v15 }
  0x27   :  { %v72_v43 = vsel %vm68_vm10, %v70_v37, 0.0  ;;  %v82_v44 = vsub.f32 %v80_v38, %v66_v31  ;;  %v92_v45 = vsub.f32 %v90_v39, %v58_v29  ;;  %v126_v17 = vsub.f32 1.0, %v48_v8 }
  0x28   :  { %v83_v46 = vsel %vm419_vm8, %v81_v41, 0.0  ;;  %v93_v47 = vsel %vm87_vm12, %v91_v42, 0.0  ;;  %v127_v19 = vsub.f32 1.0, %v50_v11 }
  0x29   :  { %v84_v48 = vsel %vm427_vm11, %v82_v44, 0.0  ;;  %v94_v49 = vsel %vm88_vm13, %v92_v45, 0.0  ;;  %v95_v50 = vadd.f32 %v83_v46, %v71_v40  ;;  %v128_v26 = vmul.f32 %v126_v17, %v387_v10 }
  0x2a   :  { %v96_v52 = vadd.f32 %v84_v48, %v72_v43  ;;  %v129_v27 = vmul.f32 %v127_v19, %v389_v12 }
  0x2b   :  { %v97_v54 = vadd.f32 %v95_v50, %v93_v47 }
  0x2c   :  { %v98_v55 = vadd.f32 %v96_v52, %v94_v49 }
  0x2d   :  { %v99_v56 = vmul.f32 0.16666667, %v97_v54 }
  0x2e   :  { %v100_v57 = vmul.f32 0.16666667, %v98_v55 }
  0x2f   :  { %v101_v58 = vadd.f32 1.0, %v99_v56 }
  0x30   :  { %v102_v59 = vadd.f32 1.0, %v100_v57 }
  0x31   :  { %v103_v60 = vfloor.f32 %v101_v58 }
  0x32   :  { %v104_v61 = vfloor.f32 %v102_v59 }
  0x33   :  { %v105_v63 = vsub.f32 %v101_v58, %v103_v60 }
  0x34   :  { %v106_v0 = vsub.f32 %v102_v59, %v104_v61 }
  0x35   :  { %v108_v1 = vadd.f32 %v107_v62, %v105_v63 }
  0x36   :  { %v109_v2 = vadd.f32 %v107_v62, %v106_v0 }
  0x37   :  { %v110_v4 = vfloor.f32 %v108_v1 }
  0x38   :  { %v111_v6 = vfloor.f32 %v109_v2 }
  0x39   :  { %v112_v7 = vsub.f32 %v108_v1, %v110_v4 }
  0x3a   :  { %v113_v9 = vsub.f32 %v109_v2, %v111_v6 }
  0x3b   :  { %v114_v13 = vmul.f32 6.0, %v112_v7 }
  0x3c   :  { %v115_v16 = vmul.f32 6.0, %v113_v9 }
  0x3d   :  { %v116_v18 = vfloor.f32 %v114_v13 }
  0x3e   :  { %v117_v20 = vfloor.f32 %v115_v16 }
  0x3f   :  { %v118_v21 = vsub.f32 %v114_v13, %v116_v18  ;;  %vm120_vm14 = vcmp.ge.f32.partialorder %v116_v18, 6.0  ;;  %v322_v22 = vadd.f32 -6.0, %v116_v18 }
  0x40   :  { %v119_v24 = vsub.f32 %v115_v16, %v117_v20  ;;  %vm121_vm15 = vcmp.ge.f32.partialorder %v117_v20, 6.0  ;;  %v323_v25 = vadd.f32 -6.0, %v117_v20 }
  0x41   :  { %v124_v14 = vsel %vm120_vm14, %v322_v22, %v116_v18  ;;  %v130_v15 = vmul.f32 %v118_v21, %v48_v8  ;;  %v136_v28 = vsub.f32 1.0, %v118_v21 }
  0x42   :  { %v125_v29 = vsel %vm121_vm15, %v323_v25, %v117_v20  ;;  %v131_v30 = vmul.f32 %v119_v24, %v50_v11  ;;  %v137_v31 = vsub.f32 1.0, %v119_v24  ;;  %vm144_vm0 = vcmp.eq.f32.partialorder %v124_v14, 0.0 }
  0x43   :  { %v132_v32 = vsub.f32 1.0, %v130_v15  ;;  %v138_v33 = vmul.f32 %v136_v28, %v48_v8  ;;  %vm145_vm1 = vcmp.eq.f32.partialorder %v125_v29, 0.0  ;;  %vm146_vm2 = vcmp.eq.f32.partialorder %v124_v14, 1.0 }
  0x44   :  { %v133_v34 = vsub.f32 1.0, %v131_v30  ;;  %v139_v35 = vmul.f32 %v137_v31, %v50_v11  ;;  %vm147_vm3 = vcmp.eq.f32.partialorder %v125_v29, 1.0  ;;  %vm148_vm4 = vcmp.eq.f32.partialorder %v124_v14, 2.0 }
  0x45   :  { %v134_v36 = vmul.f32 %v132_v32, %v387_v10  ;;  %v140_v37 = vsub.f32 1.0, %v138_v33  ;;  %vm149_vm5 = vcmp.eq.f32.partialorder %v125_v29, 2.0  ;;  %vm150_vm6 = vcmp.eq.f32.partialorder %v124_v14, 3.0 }
  0x46   :  { %v135_v38 = vmul.f32 %v133_v34, %v389_v12  ;;  %v141_v39 = vsub.f32 1.0, %v139_v35  ;;  %vm151_vm7 = vcmp.eq.f32.partialorder %v125_v29, 3.0  ;;  %vm152_vm8 = vcmp.eq.f32.partialorder %v124_v14, 4.0 }
  0x47   :  { %v142_v40 = vmul.f32 %v140_v37, %v387_v10  ;;  %vm153_vm9 = vcmp.eq.f32.partialorder %v125_v29, 4.0  ;;  %v164_v41 = vsel %vm150_vm6, %v134_v36, %v128_v26  ;;  %v172_v42 = vsel %vm152_vm8, %v387_v10, %v134_v36 }
  0x48   :  { %v143_v43 = vmul.f32 %v141_v39, %v389_v12  ;;  %v165_v44 = vsel %vm151_vm7, %v135_v38, %v129_v27  ;;  %v166_v45 = vsel %vm148_vm4, %v387_v10, %v164_v41  ;;  %v173_v46 = vsel %vm153_vm9, %v389_v12, %v135_v38 }
  0x49   :  { %v154_v47 = vsel %vm152_vm8, %v142_v40, %v387_v10  ;;  %v167_v48 = vsel %vm149_vm5, %v389_v12, %v165_v44  ;;  %v168_v49 = vsel %vm146_vm2, %v387_v10, %v166_v45  ;;  %v174_v50 = vsel %vm150_vm6, %v387_v10, %v172_v42 }
  0x4a   :  { %v155_v51 = vsel %vm153_vm9, %v143_v43, %v389_v12  ;;  %v156_v52 = vsel %vm150_vm6, %v128_v26, %v154_v47  ;;  %v169_v53 = vsel %vm147_vm3, %v389_v12, %v167_v48  ;;  %v170_v54 = vsel %vm144_vm0, %v142_v40, %v168_v49 }
  0x4b   :  { %v157_v55 = vsel %vm151_vm7, %v129_v27, %v155_v51  ;;  %v158_v56 = vsel %vm148_vm4, %v128_v26, %v156_v52  ;;  %v171_v57 = vsel %vm145_vm1, %v143_v43, %v169_v53  ;;  %v175_v58 = vsel %vm151_vm7, %v389_v12, %v173_v46 }
  0x4c   :  { %v159_v59 = vsel %vm149_vm5, %v129_v27, %v157_v55  ;;  %v160_v60 = vsel %vm146_vm2, %v134_v36, %v158_v56  ;;  %v176_v61 = vsel %vm148_vm4, %v142_v40, %v174_v50  ;;  %v177_v62 = vsel %vm149_vm5, %v143_v43, %v175_v58 }
  0x4d   :  { %v161_v63 = vsel %vm147_vm3, %v135_v38, %v159_v59  ;;  %v162_v0 = vsel %vm144_vm0, %v387_v10, %v160_v60  ;;  %v178_v1 = vsel %vm146_vm2, %v128_v26, %v176_v61  ;;  %v179_v2 = vsel %vm147_vm3, %v129_v27, %v177_v62 }
  0x4e   :  { %v163_v3 = vsel %vm145_vm1, %v389_v12, %v161_v63  ;;  %v180_v4 = vsel %vm144_vm0, %v128_v26, %v178_v1  ;;  %v181_v5 = vsel %vm145_vm1, %v129_v27, %v179_v2  ;;  %v184_v6 = vmul.f32 %v449_v23, %v162_v0 }
  0x4f   :  { %v185_v7 = vmul.f32 %v449_v23, %v163_v3  ;;  %v190_v8 = vmul.f32 %v449_v23, %v170_v54  ;;  %v191_v9 = vmul.f32 %v449_v23, %v171_v57  ;;  %v196_v10 = vmul.f32 %v449_v23, %v180_v4 }
  0x50   :  { %v186_v11 = vmax.f32 %v184_v6, 0.0  ;;  %v197_v13 = vmul.f32 %v449_v23, %v181_v5  ;;  %v218_v35 = vstv %s324_s27  ;;  %v222_v38 = vstv %s221_s28 }
  0x51   :  { %v187_v16 = vmax.f32 %v185_v7, 0.0  ;;  %v192_v17 = vmax.f32 %v190_v8, 0.0  ;;  %v193_v12 = vmax.f32 %v191_v9, 0.0  ;;  %v198_v18 = vmax.f32 %v196_v10, 0.0 }
  0x52   :  { %v188_v19 = vmin.f32 %v186_v11, 1.0  ;;  %v199_v20 = vmax.f32 %v197_v13, 0.0  ;;  %v257_v8 = vstv %s502_s29  ;;  %v261_v9 = vstv %s260_s30 }
  0x53   :  { %v189_v21 = vmin.f32 %v187_v16, 1.0  ;;  %v194_v22 = vmin.f32 %v192_v17, 1.0  ;;  %v195_v24 = vmin.f32 %v193_v12, 1.0  ;;  %v200_v25 = vmin.f32 %v198_v18, 1.0 }
  0x54   :  { %v201_v26 = vmin.f32 %v199_v20, 1.0  ;;  %v203_v14 = vmul.f32 0.2989, %v188_v19  ;;  %v219_v37 = vmul.f32 %v218_v35, %v188_v19 }
  0x55   :  { %v204_v27 = vmul.f32 0.2989, %v189_v21  ;;  %v205_v15 = vmul.f32 0.587, %v194_v22  ;;  %v206_v28 = vmul.f32 0.587, %v195_v24  ;;  %v220_v40 = vmul.f32 %v218_v35, %v189_v21 }
  0x56   :  { %v209_v29 = vmul.f32 0.114, %v200_v25  ;;  %v210_v30 = vmul.f32 0.114, %v201_v26  ;;  %v230_v41 = vmul.f32 %v218_v35, %v194_v22  ;;  %v231_v42 = vmul.f32 %v218_v35, %v195_v24 }
  0x57   :  { %v207_v31 = vadd.f32 %v205_v15, %v203_v14  ;;  %v208_v32 = vadd.f32 %v206_v28, %v204_v27  ;;  %v238_v43 = vmul.f32 %v218_v35, %v200_v25  ;;  %v239_v44 = vmul.f32 %v218_v35, %v201_v26 }
  0x59   :  { %v211_v23 = vadd.f32 %v209_v29, %v207_v31  ;;  %v212_v33 = vadd.f32 %v210_v30, %v208_v32 }
  0x5b   :  { %v213_v34 = vadd.f32 %v212_v33, %v211_v23 }
  0x5d   :  { %214 = vadd.xlane.f32.xlu0 %v213_v34 }
  0xea   :  { %v215_v36 = vpop.xlane.xlu0 %214 }
  0xeb   :  { %v217_v39 = vmul.f32 0.00390625, %v215_v36 }
  0xed   :  { %v223_v45 = vmul.f32 %v222_v38, %v217_v39 }
  0xef   :  { %v224_v46 = vadd.f32 %v223_v45, %v219_v37  ;;  %v225_v47 = vadd.f32 %v223_v45, %v220_v40  ;;  %v232_v48 = vadd.f32 %v230_v41, %v223_v45  ;;  %v233_v49 = vadd.f32 %v231_v42, %v223_v45 }
  0xf0   :  { %v240_v50 = vadd.f32 %v238_v43, %v223_v45  ;;  %v241_v51 = vadd.f32 %v239_v44, %v223_v45 }
  0xf1   :  { %v226_v52 = vmax.f32 %v224_v46, 0.0  ;;  %v227_v53 = vmax.f32 %v225_v47, 0.0  ;;  %v234_v54 = vmax.f32 %v232_v48, 0.0  ;;  %v235_v55 = vmax.f32 %v233_v49, 0.0 }
  0xf2   :  { %v242_v56 = vmax.f32 %v240_v50, 0.0  ;;  %v243_v57 = vmax.f32 %v241_v51, 0.0 }
  0xf3   :  { %v228_v58 = vmin.f32 %v226_v52, 1.0  ;;  %v229_v59 = vmin.f32 %v227_v53, 1.0  ;;  %v236_v60 = vmin.f32 %v234_v54, 1.0  ;;  %v237_v61 = vmin.f32 %v235_v55, 1.0 }
  0xf4   :  { %v244_v62 = vmin.f32 %v242_v56, 1.0  ;;  %v245_v63 = vmin.f32 %v243_v57, 1.0 }
  0xf5   :  { %v247_v0 = vmul.f32 0.2989, %v228_v58  ;;  %v248_v1 = vmul.f32 0.2989, %v229_v59  ;;  %v249_v2 = vmul.f32 0.587, %v236_v60  ;;  %v258_v13 = vmul.f32 %v257_v8, %v228_v58 }
  0xf6   :  { %v250_v3 = vmul.f32 0.587, %v237_v61  ;;  %v253_v5 = vmul.f32 0.114, %v244_v62  ;;  %v254_v7 = vmul.f32 0.114, %v245_v63  ;;  %v270_v17 = vmul.f32 %v257_v8, %v236_v60 }
  0xf7   :  { %v251_v4 = vadd.f32 %v249_v2, %v247_v0  ;;  %v278_v12 = vmul.f32 %v257_v8, %v244_v62  ;;  %v259_v18 = vmul.f32 %v257_v8, %v229_v59  ;;  %v271_v20 = vmul.f32 %v257_v8, %v237_v61 }
  0xf8   :  { %v252_v6 = vadd.f32 %v250_v3, %v248_v1  ;;  %v279_v21 = vmul.f32 %v257_v8, %v245_v63 }
  0xf9   :  { %v255_v10 = vadd.f32 %v253_v5, %v251_v4 }
  0xfa   :  { %v256_v11 = vadd.f32 %v254_v7, %v252_v6 }
  0xfb   :  { %v262_v16 = vmul.f32 %v261_v9, %v255_v10 }
  0xfc   :  { %v263_v19 = vmul.f32 %v261_v9, %v256_v11  ;;  %290 = sbr.rel (!%p287_p5) target bundleno = 268 (0x10c), region = 17 }
  0xfd   :  { %v264_v22 = vadd.f32 %v262_v16, %v258_v13  ;;  %v272_v24 = vadd.f32 %v270_v17, %v262_v16  ;;  %v280_v25 = vadd.f32 %v278_v12, %v262_v16 }
  0xfe   :  { %v265_v26 = vadd.f32 %v263_v19, %v259_v18  ;;  %v273_v14 = vadd.f32 %v271_v20, %v263_v19  ;;  %v281_v27 = vadd.f32 %v279_v21, %v263_v19 }
  0xff   :  { %v266_v15 = vmax.f32 %v264_v22, 0.0  ;;  %v274_v28 = vmax.f32 %v272_v24, 0.0  ;;  %v282_v29 = vmax.f32 %v280_v25, 0.0 }
 0x100   :  { %v267_v30 = vmax.f32 %v265_v26, 0.0  ;;  %v275_v31 = vmax.f32 %v273_v14, 0.0  ;;  %v283_v32 = vmax.f32 %v281_v27, 0.0 }
 0x101   :  { %v268_v23 = vmin.f32 %v266_v15, 1.0  ;;  %v276_v33 = vmin.f32 %v274_v28, 1.0  ;;  %v284_v34 = vmin.f32 %v282_v29, 1.0 }
 0x102   :  { %v269_v35 = vmin.f32 %v267_v30, 1.0  ;;  %v277_v36 = vmin.f32 %v275_v31, 1.0  ;;  %v285_v37 = vmin.f32 %v283_v32, 1.0 }
 0x103   :  { %v291_v38 = vmul.f32 0.2989, %v268_v23  ;;  %v293_v39 = vmul.f32 0.587, %v276_v33  ;;  %v297_v40 = vmul.f32 0.114, %v284_v34 }
 0x104   :  { %v292_v41 = vmul.f32 0.2989, %v269_v35  ;;  %v294_v42 = vmul.f32 0.587, %v277_v36  ;;  %v298_v43 = vmul.f32 0.114, %v285_v37 }
 0x105   :  { %v295_v44 = vadd.f32 %v293_v39, %v291_v38 }
 0x106   :  { %v296_v45 = vadd.f32 %v294_v42, %v292_v41 }
 0x107   :  { %v299_v46 = vadd.f32 %v297_v40, %v295_v44 }
 0x108   :  { %v300_v47 = vadd.f32 %v298_v43, %v296_v45 }
 0x109   :  { %301 = vst [vmem:[%s548_s2] sm:$0xff] %v299_v46  ;;  %303 = vst [vmem:[%s548_s2 + $0x10] sm:$0xff] %v299_v46 }
 0x10a   :  { %305 = vst [vmem:[%s548_s2 + $0x20] sm:$0xff] %v299_v46  ;;  %302 = vst [vmem:[%s548_s2 + $0x8] sm:$0xff] %v300_v47 }
 0x10b   :  { %304 = vst [vmem:[%s548_s2 + $0x18] sm:$0xff] %v300_v47  ;;  %306 = vst [vmem:[%s548_s2 + $0x28] sm:$0xff] %v300_v47 }
 0x10c PF:  { %309 = sbr.rel (%p287_p5) target bundleno = 275 (0x113), region = 21  ;;  %310 = vst [vmem:[%s548_s2] sm:$0xff] (!%p287_p5), %v268_v23  ;;  %311 = vst [vmem:[%s548_s2 + $0x8] sm:$0xff] (!%p287_p5), %v269_v35 }
 0x10d   :  { %312 = vst [vmem:[%s548_s2 + $0x10] sm:$0xff] (!%p287_p5), %v276_v33  ;;  %313 = vst [vmem:[%s548_s2 + $0x18] sm:$0xff] (!%p287_p5), %v277_v36 }
 0x10e   :  { %314 = vst [vmem:[%s548_s2 + $0x20] sm:$0xff] (!%p287_p5), %v284_v34  ;;  %315 = vst [vmem:[%s548_s2 + $0x28] sm:$0xff] (!%p287_p5), %v285_v37 }
 0x113 PF:  { %320 = vsyncpa [#allocation3], 1 }

</bundles_post_ra>
